<compile_context>
chip_gen: v7x
topology: tpu7x:2x2x1
jax: 0.10.0
libtpu: 0.0.40
codegen_flags: <defaults>
</compile_context>

<pallas_src>
import functools

import jax
import jax.numpy as jnp
from jax.experimental import pallas as pl
from jax.experimental.pallas import tpu as pltpu


def _bert_self_output_kernel(x_ref, res_ref, w_ref, b_ref, g_ref, beta_ref,
                             o_ref, *, eps):
    # x_ref:   (tm, H)  hidden_states tile (native dtype, e.g. bf16)
    # res_ref: (tm, H)  residual (input_tensor) tile
    # w_ref:   (H, H)   dense weight, pre-transposed to [in, out] (native dtype)
    # b_ref:   (1, H)   dense bias      (f32)
    # g_ref:   (1, H)   LayerNorm gamma (f32)
    # beta_ref:(1, H)   LayerNorm beta  (f32)

    # Linear on the MXU: native-dtype operands, f32 accumulation.
    y = jnp.dot(x_ref[...], w_ref[...], preferred_element_type=jnp.float32)

    # TODO(synk): dropout is identity in eval mode; training-mode dropout
    # would use pltpu.prng_seed / pltpu.prng_random_bits.

    # Bias + residual add in f32.
    z = y + b_ref[...] + res_ref[...].astype(jnp.float32)

    # LayerNorm over the last dim (f32 math).
    mean = jnp.mean(z, axis=-1, keepdims=True)
    zc = z - mean
    var = jnp.mean(zc * zc, axis=-1, keepdims=True)
    inv = jax.lax.rsqrt(var + eps)
    out = zc * inv * g_ref[...] + beta_ref[...]

    o_ref[...] = out.astype(o_ref.dtype)


def bert_self_output(hidden_states, input_tensor, w_t, b, gamma, beta,
                     *, eps=1e-12, tile_m=512):
    """BertSelfOutput forward.

    hidden_states, input_tensor: [B, S, H]
    w_t: dense weight ALREADY transposed to [H_in, H_out] (PyTorch stores the
         Linear weight as [H_out, H_in]; do w.T once, outside the hot path)
    b, gamma, beta: [H]
    """
    B, S, H = hidden_states.shape
    M = B * S

    x2 = hidden_states.reshape(M, H)
    r2 = input_tensor.reshape(M, H)

    # Small parameter vectors kept in f32 for the LayerNorm / bias math.
    b2 = b.astype(jnp.float32).reshape(1, H)
    g2 = gamma.astype(jnp.float32).reshape(1, H)
    be2 = beta.astype(jnp.float32).reshape(1, H)

    # Clamp the tile to the problem size; pad rows if M is not a multiple.
    tile_m = min(tile_m, M)
    grid_m = pl.cdiv(M, tile_m)
    M_pad = grid_m * tile_m
    if M_pad != M:
        pad = M_pad - M
        x2 = jnp.pad(x2, ((0, pad), (0, 0)))
        r2 = jnp.pad(r2, ((0, pad), (0, 0)))

    # VMEM budget: double-buffered activation tiles + resident weight + params.
    act_bytes = jnp.dtype(hidden_states.dtype).itemsize
    w_bytes = jnp.dtype(w_t.dtype).itemsize
    est = 2 * 3 * tile_m * H * act_bytes          # x, res, out (double buffered)
    est += 2 * H * H * w_bytes                    # weight (conservative: x2)
    est += 3 * 2 * H * 4                          # bias / gamma / beta
    vmem_limit = int(min(max(2 * est, 32 * 1024 * 1024), 64 * 1024 * 1024))

    kernel = functools.partial(_bert_self_output_kernel, eps=eps)
    out2 = pl.pallas_call(
        kernel,
        out_shape=jax.ShapeDtypeStruct((M_pad, H), hidden_states.dtype),
        grid_spec=pltpu.PrefetchScalarGridSpec(
            num_scalar_prefetch=0,
            grid=(grid_m,),
            in_specs=[
                pl.BlockSpec((tile_m, H), lambda i: (i, 0)),  # hidden_states
                pl.BlockSpec((tile_m, H), lambda i: (i, 0)),  # input_tensor
                pl.BlockSpec((H, H), lambda i: (0, 0)),       # weight [in, out] (resident)
                pl.BlockSpec((1, H), lambda i: (0, 0)),       # bias
                pl.BlockSpec((1, H), lambda i: (0, 0)),       # gamma
                pl.BlockSpec((1, H), lambda i: (0, 0)),       # beta
            ],
            out_specs=pl.BlockSpec((tile_m, H), lambda i: (i, 0)),
        ),
        compiler_params=pltpu.CompilerParams(
            dimension_semantics=("parallel",),
            vmem_limit_bytes=vmem_limit),
    )(x2, r2, w_t, b2, g2, be2)

    if M_pad != M:
        out2 = out2[:M]
    return out2.reshape(B, S, H)


def _reference(hidden_states, input_tensor, w, b, gamma, beta, eps=1e-12):
    """Pure-JAX reference. w in PyTorch layout [H_out, H_in]."""
    hs = hidden_states.astype(jnp.float32)
    it = input_tensor.astype(jnp.float32)
    y = jnp.einsum("bsh,oh->bso", hs, w.astype(jnp.float32)) + b
    z = y + it
    mean = jnp.mean(z, axis=-1, keepdims=True)
    var = jnp.mean((z - mean) ** 2, axis=-1, keepdims=True)
    return (z - mean) / jnp.sqrt(var + eps) * gamma + beta


if __name__ == "__main__":
    key = jax.random.PRNGKey(0)
    B, S, H = 2, 8, 128
    eps = 1e-12

    k1, k2, k3, k4 = jax.random.split(key, 4)
    hidden_states = jax.random.normal(k1, (B, S, H), dtype=jnp.float32)
    input_tensor = jax.random.normal(k2, (B, S, H), dtype=jnp.float32)
    # Linear weight in PyTorch layout [H_out, H_in]; bias; LayerNorm params.
    w = jax.random.normal(k3, (H, H), dtype=jnp.float32) * (1.0 / jnp.sqrt(H))
    b = jax.random.normal(k4, (H,), dtype=jnp.float32) * 0.01
    gamma = jnp.ones((H,), dtype=jnp.float32)
    beta = jnp.zeros((H,), dtype=jnp.float32)

    # Pre-transpose the weight ONCE, outside the hot path.
    w_t = jnp.asarray(w.T)

    ref = _reference(hidden_states, input_tensor, w, b, gamma, beta, eps=eps)

    # f32 path (tight tolerance).
    out = bert_self_output(hidden_states, input_tensor, w_t, b, gamma, beta, eps=eps)
    out = jax.block_until_ready(out)
    assert out.shape == (B, S, H)
    assert jnp.allclose(out, ref, atol=1e-4, rtol=1e-4), "f32 mismatch vs reference"

    # bf16 fast path (bf16 activations + weight, f32 LayerNorm inside; loose tol).
    out_bf16 = bert_self_output(
        hidden_states.astype(jnp.bfloat16),
        input_tensor.astype(jnp.bfloat16),
        w_t.astype(jnp.bfloat16),
        b, gamma, beta, eps=eps)
    out_bf16 = jax.block_until_ready(out_bf16)
    assert out_bf16.shape == (B, S, H)
    assert jnp.allclose(out_bf16.astype(jnp.float32), ref, atol=1e-1, rtol=1e-1), \
        "bf16 mismatch vs reference"

    print("KERNEL_OK")
</pallas_src>

<mosaic_0001>
module attributes {stable_mosaic.version = 11 : i64} {
  func.func @_bert_self_output_kernel(%arg0: i32, %arg1: memref<16x128xf32, #tpu.memory_space<vmem>>, %arg2: memref<16x128xf32, #tpu.memory_space<vmem>>, %arg3: memref<128x128xf32, #tpu.memory_space<vmem>>, %arg4: memref<1x128xf32, #tpu.memory_space<vmem>>, %arg5: memref<1x128xf32, #tpu.memory_space<vmem>>, %arg6: memref<1x128xf32, #tpu.memory_space<vmem>>, %arg7: memref<16x128xf32, #tpu.memory_space<vmem>>) attributes {dimension_semantics = [#tpu.dimension_semantics<parallel>], iteration_bounds = array<i64: 1>, scalar_prefetch = 0 : i64, scratch_operands = 0 : i64, tpu.core_type = #tpu.core_type<tc>, window_params = [{transform_indices = @transform_0, window_bounds = array<i64: 16, 128>}, {transform_indices = @transform_1, window_bounds = array<i64: 16, 128>}, {pipeline_mode = #tpu.pipeline_mode<synchronous>, transform_indices = @transform_2, window_bounds = array<i64: 128, 128>}, {pipeline_mode = #tpu.pipeline_mode<synchronous>, transform_indices = @transform_3, window_bounds = array<i64: 1, 128>}, {pipeline_mode = #tpu.pipeline_mode<synchronous>, transform_indices = @transform_4, window_bounds = array<i64: 1, 128>}, {pipeline_mode = #tpu.pipeline_mode<synchronous>, transform_indices = @transform_5, window_bounds = array<i64: 1, 128>}, {transform_indices = @transform_6, window_bounds = array<i64: 16, 128>}]} {
    %c0 = arith.constant 0 : index
    %c0_0 = arith.constant 0 : index
    %0 = vector.load %arg1[%c0, %c0_0] : memref<16x128xf32, #tpu.memory_space<vmem>>, vector<16x128xf32>
    %c0_1 = arith.constant 0 : index
    %c0_2 = arith.constant 0 : index
    %1 = vector.load %arg3[%c0_1, %c0_2] : memref<128x128xf32, #tpu.memory_space<vmem>>, vector<128x128xf32>
    %cst = arith.constant dense<0.000000e+00> : vector<16x128xf32>
    %2 = tpu.matmul %0, %1, %cst {dimension_numbers = #tpu.dot_dimension_numbers<[1], [0], [0], [1], [0, 0, 1, 1], [], []>} : vector<16x128xf32>, vector<128x128xf32>, vector<16x128xf32> -> vector<16x128xf32>
    %c0_3 = arith.constant 0 : index
    %c0_4 = arith.constant 0 : index
    %3 = vector.load %arg4[%c0_3, %c0_4] : memref<1x128xf32, #tpu.memory_space<vmem>>, vector<1x128xf32>
    %4 = vector.broadcast %3 : vector<1x128xf32> to vector<16x128xf32>
    %5 = arith.addf %2, %4 : vector<16x128xf32>
    %c0_5 = arith.constant 0 : index
    %c0_6 = arith.constant 0 : index
    %6 = vector.load %arg2[%c0_5, %c0_6] : memref<16x128xf32, #tpu.memory_space<vmem>>, vector<16x128xf32>
    %7 = arith.addf %5, %6 : vector<16x128xf32>
    %cst_7 = arith.constant dense<0.000000e+00> : vector<16xf32>
    %8 = vector.multi_reduction <add>, %7, %cst_7 [1] : vector<16x128xf32> to vector<16xf32>
    %9 = vector.shape_cast %8 : vector<16xf32> to vector<16x1xf32>
    %cst_8 = arith.constant 1.280000e+02 : f32
    %10 = vector.broadcast %cst_8 : f32 to vector<16x1xf32>
    %11 = arith.divf %9, %10 : vector<16x1xf32>
    %12 = vector.broadcast %11 : vector<16x1xf32> to vector<16x128xf32>
    %13 = arith.subf %7, %12 : vector<16x128xf32>
    %14 = arith.mulf %13, %13 : vector<16x128xf32>
    %cst_9 = arith.constant dense<0.000000e+00> : vector<16xf32>
    %15 = vector.multi_reduction <add>, %14, %cst_9 [1] : vector<16x128xf32> to vector<16xf32>
    %16 = vector.shape_cast %15 : vector<16xf32> to vector<16x1xf32>
    %cst_10 = arith.constant 1.280000e+02 : f32
    %17 = vector.broadcast %cst_10 : f32 to vector<16x1xf32>
    %18 = arith.divf %16, %17 : vector<16x1xf32>
    %cst_11 = arith.constant 9.99999996E-13 : f32
    %19 = vector.broadcast %cst_11 : f32 to vector<16x1xf32>
    %20 = arith.addf %18, %19 : vector<16x1xf32>
    %21 = math.rsqrt %20 : vector<16x1xf32>
    %22 = vector.broadcast %21 : vector<16x1xf32> to vector<16x128xf32>
    %23 = arith.mulf %13, %22 : vector<16x128xf32>
    %c0_12 = arith.constant 0 : index
    %c0_13 = arith.constant 0 : index
    %24 = vector.load %arg5[%c0_12, %c0_13] : memref<1x128xf32, #tpu.memory_space<vmem>>, vector<1x128xf32>
    %25 = vector.broadcast %24 : vector<1x128xf32> to vector<16x128xf32>
    %26 = arith.mulf %23, %25 : vector<16x128xf32>
    %c0_14 = arith.constant 0 : index
    %c0_15 = arith.constant 0 : index
    %27 = vector.load %arg6[%c0_14, %c0_15] : memref<1x128xf32, #tpu.memory_space<vmem>>, vector<1x128xf32>
    %28 = vector.broadcast %27 : vector<1x128xf32> to vector<16x128xf32>
    %29 = arith.addf %26, %28 : vector<16x128xf32>
    %c0_16 = arith.constant 0 : index
    %c0_17 = arith.constant 0 : index
    %30 = vector.load %arg7[%c0_16, %c0_17] : memref<16x128xf32, #tpu.memory_space<vmem>>, vector<16x128xf32>
    tpu.vector_store %arg7[%c0_16, %c0_17], %29 {strides = array<i32>} : memref<16x128xf32, #tpu.memory_space<vmem>>, vector<16x128xf32>,
    return
  }
  func.func @transform_0(%arg0: i32) -> (i32, i32) {
    %c0_i32 = arith.constant 0 : i32
    %c0_i32_0 = arith.constant 0 : i32
    return %arg0, %c0_i32 : i32, i32
  }
  func.func @transform_1(%arg0: i32) -> (i32, i32) {
    %c0_i32 = arith.constant 0 : i32
    %c0_i32_0 = arith.constant 0 : i32
    return %arg0, %c0_i32 : i32, i32
  }
  func.func @transform_2(%arg0: i32) -> (i32, i32) {
    %c0_i32 = arith.constant 0 : i32
    %c0_i32_0 = arith.constant 0 : i32
    %c0_i32_1 = arith.constant 0 : i32
    return %c0_i32, %c0_i32_0 : i32, i32
  }
  func.func @transform_3(%arg0: i32) -> (i32, i32) {
    %c0_i32 = arith.constant 0 : i32
    %c0_i32_0 = arith.constant 0 : i32
    %c0_i32_1 = arith.constant 0 : i32
    return %c0_i32, %c0_i32_0 : i32, i32
  }
  func.func @transform_4(%arg0: i32) -> (i32, i32) {
    %c0_i32 = arith.constant 0 : i32
    %c0_i32_0 = arith.constant 0 : i32
    %c0_i32_1 = arith.constant 0 : i32
    return %c0_i32, %c0_i32_0 : i32, i32
  }
  func.func @transform_5(%arg0: i32) -> (i32, i32) {
    %c0_i32 = arith.constant 0 : i32
    %c0_i32_0 = arith.constant 0 : i32
    %c0_i32_1 = arith.constant 0 : i32
    return %c0_i32, %c0_i32_0 : i32, i32
  }
  func.func @transform_6(%arg0: i32) -> (i32, i32) {
    %c0_i32 = arith.constant 0 : i32
    %c0_i32_0 = arith.constant 0 : i32
    return %arg0, %c0_i32 : i32, i32
  }
}

</mosaic_0001>

<bundles_post_ra>
// kernel: tpu_custom_call.1
= control target key start
LH: loop header
LB: loop body
LE: loop exit
PB: predicated region body
PF: predicated region fallthrough
CT: control target
= control target key end

     0   :  { %11 = vsyncpa [#allocation3], 0  ;;  %s539_s0 = inlined_call_operand.hbm [shape: f32[16,128], index: 0, kind: input, shape index: {}]   ;;  %s540_s1 = inlined_call_operand.hbm [shape: f32[16,128], index: 1, kind: input, shape index: {}]   ;;  %s541_s2 = inlined_call_operand.hbm [shape: f32[128,128], index: 2, kind: input, shape index: {}]   ;;  %s542_s3 = inlined_call_operand.vmem [shape: f32[1,128], index: 3, kind: input, shape index: {}]   ;;  %s543_s4 = inlined_call_operand.vmem [shape: f32[1,128], index: 4, kind: input, shape index: {}]   ;;  %s544_s5 = inlined_call_operand.vmem [shape: f32[1,128], index: 5, kind: input, shape index: {}]   ;;  %s545_s6 = inlined_call_operand.hbm [shape: f32[16,128], index: 6, kind: output, shape index: {}]  }
   0x1   :  { %12 = vsyncpa [#allocation6], 0 }
   0x2   :  { %13 = vsyncpa [#allocation4], 0  ;;  %s422_s21 = smov [#allocation5]   ;;  %s423_s23 = smov [#allocation2]  }
   0x3   :  { %s31_s22 = sshll.u32 %s422_s21, 4  ;;  %s19_s24 = sshll.u32 %s423_s23, 4  ;;  %s32_s22 = int_to_ptr.vmem [resolvable:$true] %s31_s22  ;;  %s463_s24 = int_to_ptr.vmem [resolvable:$true] %s19_s24 }
   0x4   :  { %s328_s27 = scalar_lea.hbm %s540_s1, 256 }
   0x5   :  { %p329_p0 = scmp.ne.s32.totalorder %s540_s1, %s328_s27  ;;  %p332_p1 = scmp.lt.u32.totalorder %s328_s27, %s540_s1 }
   0x7   :  { %p334_p2 = pnand %p332_p1, %p329_p0 }
   0x9   :  { %337 = shalt.err (!%p334_p2)
}
   0xa   :  { %s338_s8 = scalar_lea.vmem %s32_s22, 256  ;;  %p343_p4 = scmp.lt.s32.totalorder %s32_s22, %s32_s22 }
   0xb   :  { %p339_p3 = scmp.ne.s32.totalorder %s32_s22, %s338_s8  ;;  %p344_p5 = scmp.lt.s32.totalorder %s338_s8, %s338_s8 }
   0xd   :  { %p345_p6 = por %p344_p5, %p343_p4 }
   0xf   :  { %p346_p7 = pnand %p345_p6, %p339_p3 }
  0x11   :  { %349 = shalt.err (!%p346_p7)
}
  0x12   :  { %s424_s9 = smov 128   ;;  %s425_s10 = smov 8  }
  0x13   :  { %37 = dma.hbm_to_vmem [thread:$0]  %s540_s1, 256, %s32_s22, [#allocation6], %s424_s9, %s424_s9, %s425_s10  }
  0x14   :  { %s350_s15 = scalar_lea.hbm %s539_s0, 256 }
  0x15   :  { %p351_p8 = scmp.ne.s32.totalorder %s539_s0, %s350_s15  ;;  %p354_p9 = scmp.lt.u32.totalorder %s350_s15, %s539_s0 }
  0x17   :  { %p356_p10 = pnand %p354_p9, %p351_p8 }
  0x19   :  { %359 = shalt.err (!%p356_p10)
}
  0x1a   :  { %s360_s20 = scalar_lea.vmem %s463_s24, 256  ;;  %p365_p12 = scmp.lt.s32.totalorder %s463_s24, %s463_s24 }
  0x1b   :  { %p361_p11 = scmp.ne.s32.totalorder %s463_s24, %s360_s20  ;;  %p366_p13 = scmp.lt.s32.totalorder %s360_s20, %s360_s20 }
  0x1d   :  { %p367_p0 = por %p366_p13, %p365_p12 }
  0x1f   :  { %p368_p1 = pnand %p367_p0, %p361_p11 }
  0x21   :  { %371 = shalt.err (!%p368_p1)
}
  0x22   :  { %25 = dma.hbm_to_vmem [thread:$0]  %s539_s0, 256, %s463_s24, [#allocation3], %s424_s9, %s424_s9, %s425_s10  }
  0x23   :  { %s426_s22 = smov [#allocation7]   ;;  %s372_s27 = scalar_lea.hbm %s541_s2, 2048 }
  0x24   :  { %s43_s23 = sshll.u32 %s426_s22, 4  ;;  %p373_p2 = scmp.ne.s32.totalorder %s541_s2, %s372_s27  ;;  %s44_s23 = int_to_ptr.vmem [resolvable:$true] %s43_s23 }
  0x25   :  { %p376_p3 = scmp.lt.u32.totalorder %s372_s27, %s541_s2 }
  0x27   :  { %p378_p4 = pnand %p376_p3, %p373_p2 }
  0x29   :  { %381 = shalt.err (!%p378_p4)
}
  0x2a   :  { %s382_s8 = scalar_lea.vmem %s44_s23, 2048  ;;  %p387_p6 = scmp.lt.s32.totalorder %s44_s23, %s44_s23 }
  0x2b   :  { %p383_p5 = scmp.ne.s32.totalorder %s44_s23, %s382_s8  ;;  %p388_p7 = scmp.lt.s32.totalorder %s382_s8, %s382_s8 }
  0x2d   :  { %p389_p8 = por %p388_p7, %p387_p6 }
  0x2f   :  { %p390_p9 = pnand %p389_p8, %p383_p5 }
  0x31   :  { %393 = shalt.err (!%p390_p9)
}
  0x32   :  { %49 = dma.hbm_to_vmem [thread:$0]  %s541_s2, 2048, %s44_s23, [#allocation6], %s424_s9, %s424_s9, %s425_s10  }
  0x33   :  { %416 = dma.done.wait [#allocation3], 256  }
  0x34   :  { %417 = vsyncadd [#allocation3], 4294967040 }
  0x35   :  { %418 = dma.done.wait [#allocation6], 2304  }
  0x36   :  { %419 = vsyncadd [#allocation6], 4294964992  ;;  %v67_v0 = vld [vmem:[#allocation7] sm:$0xff]  ;;  %v68_v1 = vld [vmem:[#allocation7 + $0x8] sm:$0xff]  ;;  %s427_s15 = smov [#allocation8]  }
  0x37   :  { %v69_v2 = vld [vmem:[#allocation7 + $0x10] sm:$0xff]  ;;  %v286_v3 = vpack.c.bf16 %v68_v1, %v67_v0  ;;  %v70_v4 = vld [vmem:[#allocation7 + $0x18] sm:$0xff]  ;;  %v71_v6 = vld [vmem:[#allocation7 + $0x20] sm:$0xff]  ;;  %s217_s16 = sshll.u32 %s427_s15, 4  ;;  %s218_s16 = int_to_ptr.vmem [resolvable:$true] %s217_s16 }
  0x38   :  { %v290_v5 = vpack.c.bf16 %v70_v4, %v69_v2  ;;  %v72_v7 = vld [vmem:[#allocation7 + $0x28] sm:$0xff]  ;;  %v65_v9 = vld [vmem:[#allocation2] sm:$0xff]  ;;  %v73_v10 = vld [vmem:[#allocation7 + $0x30] sm:$0xff]  ;;  %s394_s17 = scalar_lea.vmem %s218_s16, 256  ;;  %p399_p11 = scmp.lt.s32.totalorder %s218_s16, %s218_s16 }
  0x39   :  { %287 = vmatprep.subr.bf16.mxu0 %v286_v3  ;;  %v294_v8 = vpack.c.bf16 %v72_v7, %v71_v6  ;;  %v74_v11 = vld [vmem:[#allocation7 + $0x38] sm:$0xff]  ;;  %283 = vmatprep.mubr.f32.mxu0 %v65_v9  ;;  %v75_v13 = vld [vmem:[#allocation7 + $0x40] sm:$0xff]  ;;  %v76_v14 = vld [vmem:[#allocation7 + $0x48] sm:$0xff]  ;;  %p395_p10 = scmp.ne.s32.totalorder %s218_s16, %s394_s17  ;;  %p400_p12 = scmp.lt.s32.totalorder %s394_s17, %s394_s17 }
  0x3a   :  { %289 = vmatpush3.bf16.msra.mxu0 %v286_v3  ;;  %v298_v12 = vpack.c.bf16 %v74_v11, %v73_v10  ;;  %v302_v15 = vpack.c.bf16 %v76_v14, %v75_v13  ;;  %v77_v16 = vld [vmem:[#allocation7 + $0x50] sm:$0xff]  ;;  %v78_v17 = vld [vmem:[#allocation7 + $0x58] sm:$0xff]  ;;  %v79_v19 = vld [vmem:[#allocation7 + $0x60] sm:$0xff] }
  0x3b   :  { %291 = vmatprep.subr.bf16.mxu0 %v290_v5  ;;  %v306_v18 = vpack.c.bf16 %v78_v17, %v77_v16  ;;  %v80_v20 = vld [vmem:[#allocation7 + $0x68] sm:$0xff]  ;;  %v81_v22 = vld [vmem:[#allocation7 + $0x70] sm:$0xff]  ;;  %v82_v23 = vld [vmem:[#allocation7 + $0x78] sm:$0xff]  ;;  %p401_p13 = por %p400_p12, %p399_p11 }
  0x3c   :  { %v310_v21 = vpack.c.bf16 %v80_v20, %v79_v19  ;;  %v314_v24 = vpack.c.bf16 %v82_v23, %v81_v22  ;;  %v66_v25 = vld [vmem:[#allocation2 + $0x8] sm:$0xff]  ;;  %v230_v26 = vld [vmem:[%s542_s3] ss:$0 sm:$0xff]  ;;  %v165_v29 = vld [vmem:[#allocation5] sm:$0xff] }
  0x3d   :  { %v166_v33 = vld [vmem:[#allocation5 + $0x8] sm:$0xff]  ;;  %v231_v50 = vld [vmem:[%s543_s4] ss:$0 sm:$0xff]  ;;  %p402_p0 = pnand %p401_p13, %p395_p10 }
  0x3e   :  { %293 = vmatpush3.bf16.msra.mxu0 %v290_v5  ;;  %v232_v52 = vld [vmem:[%s544_s5] ss:$0 sm:$0xff] }
  0x3f   :  { %295 = vmatprep.subr.bf16.mxu0 %v294_v8 }
  0x42   :  { %297 = vmatpush3.bf16.msra.mxu0 %v294_v8 }
  0x43   :  { %299 = vmatprep.subr.bf16.mxu0 %v298_v12 }
  0x46   :  { %301 = vmatpush3.bf16.msra.mxu0 %v298_v12 }
  0x47   :  { %303 = vmatprep.subr.bf16.mxu0 %v302_v15 }
  0x4a   :  { %305 = vmatpush3.bf16.msra.mxu0 %v302_v15 }
  0x4b   :  { %307 = vmatprep.subr.bf16.mxu0 %v306_v18 }
  0x4e   :  { %309 = vmatpush3.bf16.msra.mxu0 %v306_v18 }
  0x4f   :  { %311 = vmatprep.subr.bf16.mxu0 %v310_v21 }
  0x52   :  { %313 = vmatpush3.bf16.msra.mxu0 %v310_v21 }
  0x53   :  { %315 = vmatprep.subr.bf16.mxu0 %v314_v24 }
  0x56   :  { %317 = vmatpush3.bf16.msra.mxu0 %v314_v24 }
  0x59   :  { %284 = vmatmul.mubr.f32.vlgmr.msra.gmra.mrb[0].mxu0 %v66_v25 }
 0x12c   :  { %v285_v27 = vpop.f32.mrb[0].mxu0 }
 0x12d   :  { %v156_v28 = vpop.f32.mrb[1].mxu0  ;;  %v162_v31 = vadd.f32 %v285_v27, %v230_v26 }
 0x12e   :  { %v157_v30 = vadd.f32 %v230_v26, %v156_v28 }
 0x12f   :  { %v168_v34 = vadd.f32 %v166_v33, %v162_v31 }
 0x130   :  { %v167_v32 = vadd.f32 %v165_v29, %v157_v30 }
 0x132   :  { %169 = vadd.xlane.f32.xlu0 %v167_v32 }
 0x136   :  { %171 = vadd.xlane.f32.xlu0 %v168_v34 }
 0x1bf   :  { %v170_v35 = vpop.xlane.xlu0 %169 }
 0x1c0   :  { %v174_v36 = vmul.f32 0.0078125, %v170_v35 }
 0x1c2   :  { %v176_v37 = vsub.f32 %v167_v32, %v174_v36 }
 0x1c3   :  { %v172_v38 = vpop.xlane.xlu0 %171 }
 0x1c4   :  { %v175_v39 = vmul.f32 0.0078125, %v172_v38  ;;  %v178_v40 = vmul.f32 %v176_v37, %v176_v37 }
 0x1c6   :  { %v177_v41 = vsub.f32 %v168_v34, %v175_v39  ;;  %180 = vadd.xlane.f32.xlu1 %v178_v40 }
 0x1c8   :  { %v179_v42 = vmul.f32 %v177_v41, %v177_v41 }
 0x1ca   :  { %182 = vadd.xlane.f32.xlu1 %v179_v42 }
 0x253   :  { %v181_v43 = vpop.xlane.xlu1 %180 }
 0x254   :  { %v184_v44 = vmul.f32 0.0078125, %v181_v43 }
 0x256   :  { %v186_v45 = vadd.f32 1e-12, %v184_v44 }
 0x257   :  { %v183_v46 = vpop.xlane.xlu1 %182 }
 0x258   :  { %324 = vrsqrt.f32 %v186_v45  ;;  %v185_v47 = vmul.f32 0.0078125, %v183_v46 }
 0x25a   :  { %v187_v48 = vadd.f32 1e-12, %v185_v47 }
 0x25c   :  { %326 = vrsqrt.f32 %v187_v48 }
 0x262   :  { %v325_v49 = vpop.eup %324 }
 0x263   :  { %v190_v51 = vmul.f32 %v325_v49, %v176_v37 }
 0x265   :  { %v199_v53 = vmul.f32 %v231_v50, %v190_v51 }
 0x266   :  { %v327_v54 = vpop.eup %326 }
 0x267   :  { %v191_v55 = vmul.f32 %v327_v54, %v177_v41  ;;  %v208_v56 = vadd.f32 %v232_v52, %v199_v53 }
 0x269   :  { %v200_v57 = vmul.f32 %v231_v50, %v191_v55  ;;  %210 = vst [vmem:[#allocation8] sm:$0xff] %v208_v56 }
 0x26b   :  { %v209_v58 = vadd.f32 %v232_v52, %v200_v57 }
 0x26d   :  { %211 = vst [vmem:[#allocation8 + $0x8] sm:$0xff] %v209_v58 }
 0x26e   :  { %405 = shalt.err (!%p402_p0)
}
 0x26f   :  { %s406_s18 = scalar_lea.hbm %s545_s6, 256 }
 0x270   :  { %p407_p1 = scmp.ne.s32.totalorder %s545_s6, %s406_s18  ;;  %p410_p2 = scmp.lt.u32.totalorder %s406_s18, %s545_s6 }
 0x272   :  { %p412_p3 = pnand %p410_p2, %p407_p1 }
 0x274   :  { %415 = shalt.err (!%p412_p3)
}
 0x275   :  { %223 = dma.vmem_to_hbm [thread:$0]  %s218_s16, 256, %s545_s6, [#allocation4], %s424_s9, %s424_s9, %s425_s10  }
 0x276   :  { %420 = dma.done.wait [#allocation4], 256  }
 0x277   :  { %421 = vsyncadd [#allocation4], 4294967040 }
 0x278   :  { %227 = vsyncpa [#allocation3], 1 }
 0x279   :  { %228 = vsyncpa [#allocation6], 1 }
 0x27a   :  { %229 = vsyncpa [#allocation4], 1 }

</bundles_post_ra>
